<compile_context>
chip_gen: v6e
topology: v6e:2x2x1
jax: 0.10.0
libtpu: 0.0.40
codegen_flags: <defaults>
</compile_context>

<pallas_src>
import jax
import jax.numpy as jnp
from jax import lax
from jax.experimental import pallas as pl
from jax.experimental.pallas import tpu as pltpu

TN = 128                        # output-channel (lane) tile -> lane-dense stores
VMEM_LIMIT = 64 * 1024 * 1024   # explicit scoped-VMEM budget


def _round_up(v, m):
    return (v + m - 1) // m * m


# ----------------------------------------------------------------------------
# Fused conv kernel factory
# ----------------------------------------------------------------------------
def _make_conv_kernel(k, s, Ho, Wo, Lh, cin, tn, with_prelu, with_residual):
    """(k x k, stride-s) conv + folded-BN affine [+ PReLU] [+ residual].

    The input ref holds the s*s phase decomposition of one padded image,
    flattened to (s*s*Lh, Lw, cin); tap (dh, dw) is a static contiguous window
    of phase (dh%s, dw%s), so the taps become k*k static slices + matmuls
    accumulated in f32 (no HBM im2col, no strided in-kernel loads).

    ep_ref packs the per-channel epilogue parameters:
        row 0 = BN scale, row 1 = BN shift, row 2 = PReLU alpha (if any).
    """
    rows = Ho * Wo
    taps = [(dh, dw) for dh in range(k) for dw in range(k)]

    def kernel(*refs):
        x_ref, w_ref, ep_ref = refs[:3]
        pos = 3
        r_ref = None
        if with_residual:
            r_ref = refs[pos]; pos += 1
        o_ref = refs[pos]

        ep = ep_ref[...]                                      # (8, tn) f32
        acc = jnp.zeros((rows, tn), jnp.float32)
        for dh, dw in taps:                                   # unrolled at trace
            r0 = ((dh % s) * s + (dw % s)) * Lh + dh // s     # phase row offset
            c0 = dw // s
            win = x_ref[r0:r0 + Ho, c0:c0 + Wo, :].reshape(rows, cin)
            acc = acc + jnp.dot(win, w_ref[dh * k + dw],
                                preferred_element_type=jnp.float32)
        y = acc * ep[0:1, :] + ep[1:2, :]                     # folded BN (f32)
        if with_prelu:
            y = jnp.where(y >= 0.0, y, ep[2:3, :] * y)
        if with_residual:
            y = y + r_ref[...]
        o_ref[...] = y.astype(o_ref.dtype)

    return kernel


# ----------------------------------------------------------------------------
# Pallas wrapper: one ConvUnit (conv + BN [+ PReLU] [+ residual]) per call
# ----------------------------------------------------------------------------
def conv_unit(x_nhwc, w_oihw, scale, shift, *, k, stride, pad,
              alpha=None, residual=None, pre_scale=None, pre_shift=None,
              mxu_dtype=jnp.bfloat16, out_dtype=jnp.float32):
    """Returns (out2d, (Ho, Wo, Coutp)) with out2d: (N*Ho*Wo, Coutp), Coutp=128k."""
    s = int(stride)
    # A 1x1 / pad-0 strided conv == spatial subsample, then 1x1 stride-1 conv.
    if k == 1 and pad == 0 and s > 1:
        x_nhwc = x_nhwc[:, ::s, ::s, :]
        s = 1

    N, H, W, C = x_nhwc.shape
    Cout, cin_w = w_oihw.shape[0], w_oihw.shape[1]
    assert cin_w == C, (w_oihw.shape, x_nhwc.shape)

    Ho = (H + 2 * pad - k) // s + 1
    Wo = (W + 2 * pad - k) // s + 1
    rows = Ho * Wo
    assert rows % 8 == 0 and Wo % 8 == 0, (Ho, Wo)   # sublane-aligned tiles

    Lh = (k - 1) // s + Ho                 # per-phase extents (rows / cols)
    Lw = (k - 1) // s + Wo
    Hq, Wq = s * Lh, s * Lw
    assert Hq >= H + 2 * pad and Wq >= W + 2 * pad

    # --- prep: one fused XLA pass (affine + pad + phase split + cast) -------
    x = x_nhwc
    if pre_scale is not None:              # BN of the conv *input* (BN0); applied
        x = x.astype(jnp.float32) * pre_scale + pre_shift   # before zero padding
    xq = jnp.pad(x, ((0, 0), (pad, Hq - H - pad), (pad, Wq - W - pad), (0, 0)))
    phases = xq.reshape(N, Lh, s, Lw, s, C).transpose(0, 2, 4, 1, 3, 5)
    phases = phases.reshape(N * s * s * Lh, Lw, C).astype(mxu_dtype)

    Coutp = _round_up(Cout, TN)            # lane-dense output channels
    w = jnp.transpose(w_oihw, (2, 3, 1, 0)).reshape(k * k, C, Cout)
    w = jnp.pad(w.astype(jnp.float32),
                ((0, 0), (0, 0), (0, Coutp - Cout))).astype(mxu_dtype)

    def chan(v):                           # (Cout,) -> padded (1, Coutp) f32
        return jnp.pad(v.astype(jnp.float32), (0, Coutp - Cout)).reshape(1, Coutp)

    with_prelu = alpha is not None
    with_res = residual is not None

    # Single sublane-aligned epilogue-parameter slab: one tiny DMA per step.
    ep_rows = [chan(scale), chan(shift),
               chan(alpha) if with_prelu else jnp.zeros((1, Coutp), jnp.float32)]
    ep = jnp.concatenate(ep_rows + [jnp.zeros((8 - len(ep_rows), Coutp),
                                              jnp.float32)], axis=0)

    args = [phases, w, ep]
    in_specs = [
        pl.BlockSpec((s * s * Lh, Lw, C), lambda n, j: (n, 0, 0)),
        pl.BlockSpec((k * k, C, TN),      lambda n, j: (0, 0, j)),
        pl.BlockSpec((8, TN),             lambda n, j: (0, j)),
    ]
    if with_res:
        r = residual.astype(jnp.float32)
        assert r.shape == (N * rows, Coutp), (r.shape, (N * rows, Coutp))
        args.append(r)
        in_specs.append(pl.BlockSpec((rows, TN), lambda n, j: (n, j)))

    kernel = _make_conv_kernel(k, s, Ho, Wo, Lh, C, TN, with_prelu, with_res)

    # Advisory cost hint so XLA schedules the prep/epilogue fusions sensibly.
    itemsize = jnp.dtype(mxu_dtype).itemsize
    bytes_in = (phases.size * itemsize + w.size * itemsize + ep.size * 4
                + (N * rows * Coutp * 4 if with_res else 0))
    bytes_out = N * rows * Coutp * jnp.dtype(out_dtype).itemsize
    cost = pl.CostEstimate(flops=int(2 * N * rows * k * k * C * Coutp),
                           transcendentals=0,
                           bytes_accessed=int(bytes_in + bytes_out))

    out = pl.pallas_call(
        kernel,
        out_shape=jax.ShapeDtypeStruct((N * rows, Coutp), out_dtype),
        grid_spec=pltpu.PrefetchScalarGridSpec(
            num_scalar_prefetch=0,
            grid=(N, Coutp // TN),          # cout axis inner: the image's phase
            in_specs=in_specs,              # block index is constant across it,
            out_specs=pl.BlockSpec((rows, TN), lambda n, j: (n, j)),  # so its DMA
        ),                                  # is not re-issued.
        compiler_params=pltpu.CompilerParams(
            dimension_semantics=("parallel", "parallel"),
            vmem_limit_bytes=VMEM_LIMIT),
        cost_estimate=cost,
    )(*args)
    return out, (Ho, Wo, Coutp)


# ----------------------------------------------------------------------------
# Parameter helpers
# ----------------------------------------------------------------------------
def fold_bn(gamma, beta, mean, var, eps=1e-5):
    scale = gamma / jnp.sqrt(var + eps)
    shift = beta - mean * scale
    return scale, shift


def make_params(key, cin, cout, stride):
    ks = jax.random.split(key, 16)

    def bn_params(k, c):
        k1, k2, k3, k4 = jax.random.split(k, 4)
        gamma = 1.0 + 0.1 * jax.random.normal(k1, (c,), jnp.float32)
        beta = 0.1 * jax.random.normal(k2, (c,), jnp.float32)
        mean = 0.1 * jax.random.normal(k3, (c,), jnp.float32)
        var = jax.random.uniform(k4, (c,), jnp.float32, 0.5, 1.5)
        return (gamma, beta, mean, var)

    p = {
        "bn0": bn_params(ks[0], cin),
        "w1": 0.1 * jax.random.normal(ks[1], (cout, cin, 3, 3), jnp.float32),
        "bn1": bn_params(ks[2], cout),
        "prelu_alpha": 0.25 * jnp.ones((cout,), jnp.float32)
        + 0.05 * jax.random.normal(ks[3], (cout,), jnp.float32),
        "w2": 0.1 * jax.random.normal(ks[4], (cout, cout, 3, 3), jnp.float32),
        "bn2": bn_params(ks[5], cout),
    }
    if stride > 1:
        p["w_ds"] = 0.1 * jax.random.normal(ks[6], (cout, cin, 1, 1), jnp.float32)
        p["bn_ds"] = bn_params(ks[7], cout)
    return p


# ----------------------------------------------------------------------------
# IRNBlock forward (Pallas) and a plain-JAX reference
# ----------------------------------------------------------------------------
def irn_block_pallas(x_nchw, params, stride, *, mxu_dtype=jnp.bfloat16):
    x = jnp.transpose(x_nchw, (0, 2, 3, 1)).astype(jnp.float32)     # NHWC
    N, H, W, Cin = x.shape
    Cout = params["w1"].shape[0]
    Coutp = _round_up(Cout, TN)

    # residual branch (uses the ORIGINAL, pre-BN x)
    if stride > 1:
        sc_d, sh_d = fold_bn(*params["bn_ds"])
        res, _ = conv_unit(x, params["w_ds"], sc_d, sh_d,
                           k=1, stride=stride, pad=0,
                           mxu_dtype=mxu_dtype, out_dtype=jnp.float32)
    else:
        assert Cin == Cout, "identity residual requires cin == cout"
        res = jnp.pad(x.reshape(N * H * W, Cin), ((0, 0), (0, Coutp - Cin)))

    # ConvUnit #1: BN0 (fused into prep) -> 3x3/s1 conv -> BN1 -> PReLU.
    sc0, sh0 = fold_bn(*params["bn0"])
    sc1, sh1 = fold_bn(*params["bn1"])
    h2d, (H1, W1, C1p) = conv_unit(
        x, params["w1"], sc1, sh1, k=3, stride=1, pad=1,
        alpha=params["prelu_alpha"], pre_scale=sc0, pre_shift=sh0,
        mxu_dtype=mxu_dtype, out_dtype=mxu_dtype)   # keep h in the MXU dtype
    h = h2d.reshape(N, H1, W1, C1p)                 # padded channels are exact 0

    # ConvUnit #2: 3x3/stride conv -> BN2, with the residual add fused in.
    sc2, sh2 = fold_bn(*params["bn2"])
    w2 = params["w2"]
    w2p = jnp.pad(w2, ((0, 0), (0, C1p - w2.shape[1]), (0, 0), (0, 0)))
    out2d, (H2, W2, C2p) = conv_unit(
        h, w2p, sc2, sh2, k=3, stride=stride, pad=1, residual=res,
        mxu_dtype=mxu_dtype, out_dtype=jnp.float32)
    out = out2d.reshape(N, H2, W2, C2p)[..., :Cout]
    return jnp.transpose(out, (0, 3, 1, 2))         # back to NCHW


def irn_block_ref(x_nchw, params, stride):
    x = jnp.transpose(x_nchw, (0, 2, 3, 1)).astype(jnp.float32)

    def bn(t, bp):
        sc, sh = fold_bn(*bp)
        return t * sc + sh

    def conv(t, w_oihw, s, p):
        w = jnp.transpose(w_oihw, (2, 3, 1, 0))  # HWIO
        return lax.conv_general_dilated(
            t, w, (s, s), [(p, p), (p, p)],
            dimension_numbers=("NHWC", "HWIO", "NHWC"))

    if stride > 1:
        y = bn(conv(x, params["w_ds"], stride, 0), params["bn_ds"])
    else:
        y = x

    h = bn(x, params["bn0"])
    h = bn(conv(h, params["w1"], 1, 1), params["bn1"])
    a = params["prelu_alpha"]
    h = jnp.where(h >= 0, h, a * h)
    h = bn(conv(h, params["w2"], stride, 1), params["bn2"])
    out = h + y
    return jnp.transpose(out, (0, 3, 1, 2))


# ----------------------------------------------------------------------------
if __name__ == "__main__":
    cin, cout, stride = 4, 8, 2
    key = jax.random.PRNGKey(0)
    kx, kp = jax.random.split(key)

    x = jax.random.normal(kx, (2, cin, 16, 16), jnp.float32)   # NCHW like PyTorch
    params = make_params(kp, cin, cout, stride)

    ref = irn_block_ref(x, params, stride)

    # Exact mode (f32 MXU operands): tight check of the structure / tap math.
    out_f32 = jax.block_until_ready(
        irn_block_pallas(x, params, stride, mxu_dtype=jnp.float32))
    assert out_f32.shape == (2, cout, 8, 8), out_f32.shape
    assert jnp.allclose(out_f32, ref, atol=1e-4, rtol=1e-4), (
        float(jnp.max(jnp.abs(out_f32 - ref))))

    # Perf mode (bf16 MXU operands, f32 accumulate + f32 epilogue): tolerance
    # reflects bf16 rounding of the conv operands only.
    out_bf16 = jax.block_until_ready(
        irn_block_pallas(x, params, stride, mxu_dtype=jnp.bfloat16))
    assert out_bf16.shape == (2, cout, 8, 8), out_bf16.shape
    assert jnp.allclose(out_bf16, ref, atol=5e-2, rtol=5e-2), (
        float(jnp.max(jnp.abs(out_bf16 - ref))))

    print("KERNEL_OK")
</pallas_src>

<mosaic_0001>
module attributes {stable_mosaic.version = 11 : i64} {
  func.func @kernel(%arg0: i32, %arg1: i32, %arg2: memref<8x8x4xf32, #tpu.memory_space<vmem>>, %arg3: memref<1x4x128xf32, #tpu.memory_space<vmem>>, %arg4: memref<8x128xf32, #tpu.memory_space<vmem>>, %arg5: memref<64x128xf32, #tpu.memory_space<vmem>>) attributes {dimension_semantics = [#tpu.dimension_semantics<parallel>, #tpu.dimension_semantics<parallel>], iteration_bounds = array<i64: 2, 1>, scalar_prefetch = 0 : i64, scratch_operands = 0 : i64, tpu.core_type = #tpu.core_type<tc>, window_params = [{transform_indices = @transform_0, window_bounds = array<i64: 8, 8, 4>}, {transform_indices = @transform_1, window_bounds = array<i64: 1, 4, 128>}, {transform_indices = @transform_2, window_bounds = array<i64: 8, 128>}, {transform_indices = @transform_3, window_bounds = array<i64: 64, 128>}]} {
    %c0 = arith.constant 0 : index
    %c0_0 = arith.constant 0 : index
    %0 = vector.load %arg4[%c0, %c0_0] : memref<8x128xf32, #tpu.memory_space<vmem>>, vector<8x128xf32>
    %cst = arith.constant 0.000000e+00 : f32
    %1 = vector.broadcast %cst : f32 to vector<64x128xf32>
    %c0_1 = arith.constant 0 : index
    %c0_2 = arith.constant 0 : index
    %c0_3 = arith.constant 0 : index
    %2 = vector.load %arg2[%c0_1, %c0_2, %c0_3] : memref<8x8x4xf32, #tpu.memory_space<vmem>>, vector<8x8x4xf32>
    %3 = vector.shape_cast %2 : vector<8x8x4xf32> to vector<64x4xf32>
    %c0_4 = arith.constant 0 : index
    %c0_5 = arith.constant 0 : index
    %c0_6 = arith.constant 0 : index
    %4 = vector.load %arg3[%c0_4, %c0_5, %c0_6] : memref<1x4x128xf32, #tpu.memory_space<vmem>>, vector<1x4x128xf32>
    %5 = vector.shape_cast %4 : vector<1x4x128xf32> to vector<4x128xf32>
    %cst_7 = arith.constant dense<0.000000e+00> : vector<64x128xf32>
    %6 = tpu.matmul %3, %5, %cst_7 {dimension_numbers = #tpu.dot_dimension_numbers<[1], [0], [0], [1], [0, 0, 1, 1], [], []>} : vector<64x4xf32>, vector<4x128xf32>, vector<64x128xf32> -> vector<64x128xf32>
    %7 = arith.addf %1, %6 : vector<64x128xf32>
    %8 = vector.extract_strided_slice %0 {offsets = [0, 0], sizes = [1, 128], strides = [1, 1]} : vector<8x128xf32> to vector<1x128xf32>
    %9 = vector.broadcast %8 : vector<1x128xf32> to vector<64x128xf32>
    %10 = arith.mulf %7, %9 : vector<64x128xf32>
    %11 = vector.extract_strided_slice %0 {offsets = [1, 0], sizes = [1, 128], strides = [1, 1]} : vector<8x128xf32> to vector<1x128xf32>
    %12 = vector.broadcast %11 : vector<1x128xf32> to vector<64x128xf32>
    %13 = arith.addf %10, %12 : vector<64x128xf32>
    %c0_8 = arith.constant 0 : index
    %c0_9 = arith.constant 0 : index
    %14 = vector.load %arg5[%c0_8, %c0_9] : memref<64x128xf32, #tpu.memory_space<vmem>>, vector<64x128xf32>
    tpu.vector_store %arg5[%c0_8, %c0_9], %13 {strides = array<i32>} : memref<64x128xf32, #tpu.memory_space<vmem>>, vector<64x128xf32>,
    return
  }
  func.func @transform_0(%arg0: i32, %arg1: i32) -> (i32, i32, i32) {
    %c0_i32 = arith.constant 0 : i32
    %c0_i32_0 = arith.constant 0 : i32
    %c0_i32_1 = arith.constant 0 : i32
    return %arg0, %c0_i32, %c0_i32_0 : i32, i32, i32
  }
  func.func @transform_1(%arg0: i32, %arg1: i32) -> (i32, i32, i32) {
    %c0_i32 = arith.constant 0 : i32
    %c0_i32_0 = arith.constant 0 : i32
    %c0_i32_1 = arith.constant 0 : i32
    return %c0_i32, %c0_i32_0, %arg1 : i32, i32, i32
  }
  func.func @transform_2(%arg0: i32, %arg1: i32) -> (i32, i32) {
    %c0_i32 = arith.constant 0 : i32
    %c0_i32_0 = arith.constant 0 : i32
    return %c0_i32, %arg1 : i32, i32
  }
  func.func @transform_3(%arg0: i32, %arg1: i32) -> (i32, i32) {
    %c0_i32 = arith.constant 0 : i32
    return %arg0, %arg1 : i32, i32
  }
}

</mosaic_0001>

<bundles_post_ra>
// kernel: tpu_custom_call.1
= control target key start
LH: loop header
LB: loop body
LE: loop exit
PB: predicated region body
PF: predicated region fallthrough
CT: control target
= control target key end

     0   :  { %8 = vsyncpa [#allocation3], 0  ;;  %s852_s0 = inlined_call_operand.vmem [shape: f32[16,8,4], index: 0, kind: input, shape index: {}]   ;;  %s853_s1 = inlined_call_operand.vmem [shape: f32[1,4,128], index: 1, kind: input, shape index: {}]   ;;  %s854_s2 = inlined_call_operand.vmem [shape: f32[8,128], index: 2, kind: input, shape index: {}]   ;;  %s855_s3 = inlined_call_operand.hbm [shape: f32[128,128], index: 3, kind: output, shape index: {}]  }
   0x1   :  { %10 = vsyncpa [#allocation3 + $0x1], 0  ;;  %s721_s12 = smov 0   ;;  %s723_s13 = smov 0  }
   0x2   :  { %s725_s14 = smov 0   ;;  %s727_s15 = smov 0  }
   0x3   :  { %s729_s16 = smov 0   ;;  %s731_s17 = smov 0  }
   0x4 LB: > { %s513_s18 = sadd.s32 4294967295, %s696_s17   ;;  %s514_s19 = sadd.s32 4294967294, %s696_s17   ;;  %s696_s17 = sphi %s731_s17, %s16_s17   ;;  %s692_s16 = sphi %s729_s16, %s862_s16   ;;  %s688_s15 = sphi %s727_s15, %s861_s15   ;;  %s684_s14 = sphi %s725_s14, %s860_s14   ;;  %s680_s13 = sphi %s723_s13, %s859_s13   ;;  %s676_s12 = sphi %s721_s12, %s858_s12  }
   0x5   : > { %s28_s20 = sadd.s32 1, %s692_s16  ;;  %s115_s21 = sadd.s32 1, %s684_s14 }
   0x6   : > { %p30_p0 = scmp.ge.s32.totalorder %s28_s20, 2  ;;  %p125_p1 = scmp.ne.s32.totalorder %s684_s14, %s680_s13 }
   0x7   : > { %p126_p2 = scmp.eq.s32.totalorder %s513_s18, 1  ;;  %p131_p3 = scmp.ne.s32.totalorder %s680_s13, %s676_s12 }
   0x8   : > { %s864_s20 = smov (%p30_p0, %s28_s20), 0  ;;  %p132_p5 = scmp.eq.s32.totalorder %s514_s19, 1 }
   0x9   : > { %p761_p4 = por %p126_p2, %p125_p1  ;;  %s110_s23 = ssub.s32 %s692_s16, %s864_s20 }
   0xa   : > { %p519_p6 = scmp.ge.s32.totalorder %s696_s17, 1  ;;  %p113_p7 = scmp.eq.s32.totalorder %s110_s23, 0 }
   0xb   : > { %p768_p8 = por %p132_p5, %p131_p3  ;;  %p173_p9 = scmp.lt.s32.totalorder %s696_s17, 3 }
   0xc   : > { %s774_s25 = scalar_select %p113_p7, %s684_s14, %s115_s21  }
   0xd   : > { %p174_p10 = pnand %p519_p6, %p173_p9 }
   0xe   : > { %s521_s28 = sshll.u32 (!%p174_p10), %s688_s15, 3  ;;  %s202_s8 = sand.u32 (!%p174_p10), 1, %s680_s13  }
   0xf   : > { %177 = sbr.rel (%p174_p10) target bundleno = 243 (0xf3), region = 32  ;;  %p206_p11 = scmp.lt.s32.totalorder (!%p174_p10), %s521_s28, 15 }
  0x10   : > { %s520_s9 = sshll.u32 (!%p174_p10), %s202_s8, 6  ;;  %s537_s11 = sshll.u32 (!%p174_p10), %s688_s15, 10 }
  0x11   : > { %s204_s10 = scalar_lea.vmem (!%p174_p10), [#allocation2], %s520_s9  ;;  %s801_s23 = scalar_lea.hbm (!%p174_p10), %s855_s3, %s537_s11 }
  0x12   : > { %s411_s18 = sshll.u32 (!%p174_p10), %s204_s10, 4  ;;  %s807_s15 = scalar_lea.sflag (!%p174_p10), [#allocation3], %s202_s8  ;;  %s803_s18 = int_to_ptr.vmem [resolvable:$true] %s411_s18 }
  0x13   : > { %s620_s26 = scalar_lea.vmem (!%p174_p10), %s803_s18, 1024  ;;  %s698_s27 = smov (!%p174_p10), [#allocation2]  }
  0x14   : > { %v229_v0 = vld [vmem:[%s853_s1] sm:$0xf]  ;;  %vm255_vm0 = vcmask 1043456   ;;  %s866_s28 = smov (!%p206_p11, %s521_s28), 15  ;;  %vm230_vm1 = vcmask 31744   ;;  %v364_v9 = vlaneseq  ;;  %p621_p12 = scmp.ne.s32.totalorder %s803_s18, %s620_s26 }
  0x15   : > { %547 = vmatprep.subr.msk.mxu0 %vm255_vm0, %v229_v0  ;;  %561 = vmatprep.subr.msk.mxu1 %vm255_vm0, %v229_v0  ;;  %s522_s29 = sshll.u32 %s866_s28, 3  ;;  %v220_v12 = vld [vmem:[%s854_s2] sm:$0xff]  ;;  %s624_s28 = sshll.u32 %s698_s27, 4  ;;  %s625_s28 = int_to_ptr.vmem [resolvable:$false] %s624_s28 }
  0x16   : > { %548 = vmatpush3.msk.msra.mxu0 %vm255_vm0, %v229_v0  ;;  %562 = vmatpush3.msk.msra.mxu1 %vm255_vm0, %v229_v0  ;;  %s209_s5 = scalar_lea.vmem %s852_s0, %s522_s29  ;;  %v365_v10 = vshrl.u32 %v364_v9, 7  ;;  %p622_p13 = pnand %p621_p12, %p761_p4 }
  0x17   : > { %v221_v1 = vld [vmem:[%s209_s5] sm:$0xff]  ;;  %v222_v3 = vld [vmem:[%s209_s5 + $0x8] sm:$0xff]  ;;  %v223_v5 = vld [vmem:[%s209_s5 + $0x10] sm:$0xff]  ;;  %s626_s29 = scalar_lea.vmem %s625_s28, 2048  ;;  %p627_p1 = scmp.lt.s32.totalorder %s803_s18, %s625_s28 }
  0x18   : > { %v225_v2 = vld [vmem:[%s209_s5 + $0x20] sm:$0xff]  ;;  %549 = vmatprep.mubr.msk.f32.mxu0 %vm230_vm1, %v221_v1  ;;  %v226_v4 = vld [vmem:[%s209_s5 + $0x28] sm:$0xff]  ;;  %v227_v6 = vld [vmem:[%s209_s5 + $0x30] sm:$0xff]  ;;  %v366_v11 = vsub.s32 0, %v365_v10  ;;  %v378_v13 = vsub.s32 1, %v365_v10  ;;  %p623_p0 = pneg %p622_p13  ;;  %p628_p2 = scmp.lt.s32.totalorder %s626_s29, %s620_s26 }
  0x19   : > { %555 = vmatprep.mubr.msk.f32.mxu1 %vm230_vm1, %v225_v2  ;;  %550 = vmatmul.mubr.msk.f32.vlgmr.msra.gmra.mxu0 %vm230_vm1, %v222_v3  ;;  %v224_v7 = vld [vmem:[%s209_s5 + $0x18] sm:$0xff] }
  0x1a   : > { %556 = vmatmul.mubr.msk.f32.vlgmr.msra.gmra.mxu1 %vm230_vm1, %v226_v4  ;;  %552 = vmatprep.mubr.msk.f32.mxu0 %vm230_vm1, %v223_v5  ;;  %v228_v8 = vld [vmem:[%s209_s5 + $0x38] sm:$0xff]  ;;  %v367_v14 = vrot.slane %v220_v12, %v366_v11  ;;  %v379_v15 = vrot.slane %v220_v12, %v378_v13  ;;  %p629_p3 = por %p628_p2, %p627_p1 }
  0x1b   : > { %558 = vmatprep.mubr.msk.f32.mxu1 %vm230_vm1, %v227_v6 }
  0x1c   : > { %p630_p5 = pnand %p629_p3, %p623_p0 }
  0x1d   : > { %553 = vmatmul.mubr.msk.f32.gmra.mxu0 %vm230_vm1, %v224_v7 }
  0x1e   : > { %559 = vmatmul.mubr.msk.f32.gmra.mxu1 %vm230_vm1, %v228_v8 }
  0xd9   : > { %v551_v16 = vpop.f32.mrf.mxu0 }
  0xda   : > { %v557_v17 = vpop.f32.mrf.mxu1  ;;  %v369_v18 = vmul.f32 %v551_v16, %v367_v14 }
  0xdb   : > { %v373_v19 = vmul.f32 %v557_v17, %v367_v14  ;;  %v325_v20 = vpop.f32.mrf.mxu0 }
  0xdc   : > { %v345_v21 = vpop.f32.mrf.mxu1  ;;  %v381_v22 = vadd.f32 %v379_v15, %v369_v18  ;;  %v368_v24 = vmul.f32 %v367_v14, %v325_v20 }
  0xdd   : > { %v385_v23 = vadd.f32 %v379_v15, %v373_v19  ;;  %v372_v25 = vmul.f32 %v367_v14, %v345_v21  ;;  %v554_v26 = vpop.f32.mrf.mxu0 }
  0xde   : > { %v560_v27 = vpop.f32.mrf.mxu1  ;;  %389 = vst [vmem:[%s204_s10 + $0x8] sm:$0xff] %v381_v22  ;;  %v380_v28 = vadd.f32 %v379_v15, %v368_v24  ;;  %v371_v30 = vmul.f32 %v554_v26, %v367_v14 }
  0xdf   : > { %393 = vst [vmem:[%s204_s10 + $0x28] sm:$0xff] %v385_v23  ;;  %v384_v29 = vadd.f32 %v379_v15, %v372_v25  ;;  %v375_v31 = vmul.f32 %v560_v27, %v367_v14  ;;  %v335_v32 = vpop.f32.mrf.mxu0 }
  0xe0   : > { %v355_v33 = vpop.f32.mrf.mxu1  ;;  %388 = vst [vmem:[%s204_s10] sm:$0xff] %v380_v28  ;;  %v383_v34 = vadd.f32 %v379_v15, %v371_v30  ;;  %v370_v36 = vmul.f32 %v367_v14, %v335_v32 }
  0xe1   : > { %392 = vst [vmem:[%s204_s10 + $0x20] sm:$0xff] %v384_v29  ;;  %v387_v35 = vadd.f32 %v379_v15, %v375_v31  ;;  %v374_v37 = vmul.f32 %v367_v14, %v355_v33 }
  0xe2   : > { %391 = vst [vmem:[%s204_s10 + $0x18] sm:$0xff] %v383_v34  ;;  %v382_v38 = vadd.f32 %v379_v15, %v370_v36 }
  0xe3   : > { %395 = vst [vmem:[%s204_s10 + $0x38] sm:$0xff] %v387_v35  ;;  %v386_v39 = vadd.f32 %v379_v15, %v374_v37 }
  0xe4   : > { %390 = vst [vmem:[%s204_s10 + $0x10] sm:$0xff] %v382_v38 }
  0xe5   : > { %394 = vst [vmem:[%s204_s10 + $0x30] sm:$0xff] %v386_v39 }
  0xe6   : > { %633 = shalt.err (!%p630_p5)
}
  0xe7   : > { %s634_s30 = scalar_lea.hbm %s801_s23, 1024  ;;  %s638_s6 = scalar_lea.hbm %s855_s3, 2048 }
  0xe8   : > { %p635_p6 = scmp.ne.s32.totalorder %s801_s23, %s634_s30  ;;  %p639_p10 = scmp.lt.s32.totalorder %s801_s23, %s855_s3 }
  0xe9   : > { %p640_p11 = scmp.lt.s32.totalorder %s638_s6, %s634_s30 }
  0xea   : > { %p636_p7 = pnand %p635_p6, %p761_p4 }
  0xeb   : > { %p641_p12 = por %p640_p11, %p639_p10 }
  0xec   : > { %p637_p9 = pneg %p636_p7 }
  0xee   : > { %p642_p13 = pnand %p641_p12, %p637_p9 }
  0xf0   : > { %645 = shalt.err (!%p642_p13)
}
  0xf1   : > { %s699_s9 = smov 128   ;;  %s700_s10 = smov 8  }
  0xf2   : > { %563 = dma.vmem_to_hbm [thread:$0]  (%p761_p4), %s803_s18, 1024, %s801_s23, %s807_s15, %s699_s9, %s699_s9, %s700_s10  }
  0xf3 PF: > { %p569_p0 = scmp.ge.s32.totalorder %s696_s17, 2  ;;  %s426_s11 = sand.u32 1, %s676_s12  }
  0xf4   : > { %s427_s19 = scalar_lea.sflag [#allocation3], %s426_s11 }
  0xf5   : > { %p566_p1 = pnand %p569_p0, %p768_p8 }
  0xf7   : > { %p567_p2 = pneg %p566_p1 }
  0xf9   : > { %671 = dma.done.wait (%p567_p2), %s427_s19, 1024  }
  0xfa   : > { %673 = vsyncadd (%p567_p2), %s427_s19, 4294966272  ;;  %s16_s17 = sadd.s32 1, %s696_s17   ;;  %s858_s12 = smov %s680_s13 }
  0xfb   : > { %p13_p3 = scmp.ge.s32.totalorder %s16_s17, 4   ;;  %s859_s13 = smov %s684_s14 }
  0xfc   : > { %s860_s14 = smov %s774_s25  ;;  %s861_s15 = smov %s692_s16 }
  0xfd   : > { %s862_s16 = smov %s864_s20  ;;  %15 = sbr.rel (!%p13_p3) target bundleno = 4 (0x4), region = 73 }
 0x102   :  { %432 = vsyncpa [#allocation3], 1 }
 0x103   :  { %434 = vsyncpa [#allocation3 + $0x1], 1 }

</bundles_post_ra>
